<compile_context>
chip_gen: v5e
topology: v5e:2x2
jax: 0.10.0
libtpu: 0.0.40
codegen_flags: <defaults>
</compile_context>

<pallas_src>
import math

import jax
import jax.numpy as jnp
from jax.experimental import pallas as pl
from jax.experimental.pallas import tpu as pltpu

_LANES = 128
_MAX_BLOCK_ROWS = 1024   # (1024, 128) f32 = 512 KiB per pipeline buffer
_MAX_CHUNKS = 8          # parallel chunks (>= 2 gives both v7x TensorCores work)


def _ceil_div(a, b):
    return -(-a // b)


def _round_up(a, b):
    return _ceil_div(a, b) * b


def _to_lane_matrix(x, pad_value):
    """Flatten to f32 and reshape to (rows, 128).

    Pads with the reduction identity only when the flat size is not lane aligned
    (fewer than 128 extra elements); in the common aligned case this is a free
    reshape, so no extra HBM copy of the full tensor is made."""
    flat = x.reshape(-1).astype(jnp.float32)
    n = flat.shape[0]
    rem = n % _LANES
    if rem:
        flat = jnp.pad(flat, (0, _LANES - rem), constant_values=pad_value)
    return flat.reshape(-1, _LANES)


def _clamped_index_map(nblocks, inner_steps):
    """Block index = min(linear step, last block) -> memory-safe; the repeated
    index means Pallas skips the DMA and the kernel's pl.when skips the work."""
    def index_map(c, s):
        b = c * inner_steps + s
        return (jnp.minimum(b, nblocks - 1), 0)
    return index_map


def _make_fused_kernel(inner_steps, br_mse, rows_mse, br_liks, rows_liks):
    n_lik = len(br_liks)
    n_in = 2 + n_lik
    nb_mse = _ceil_div(rows_mse, br_mse)
    nb_liks = [_ceil_div(r, b) for r, b in zip(rows_liks, br_liks)]
    full_mse = rows_mse // br_mse                       # fully-populated blocks
    full_liks = [r // b for r, b in zip(rows_liks, br_liks)]

    def kernel(*refs):
        xhat_ref = refs[0]
        tgt_ref = refs[1]
        lik_refs = refs[2:n_in]
        out_ref = refs[n_in]                      # (1, 2) SMEM partial-sum block
        acc_sq = refs[n_in + 1]                   # (br_mse, 128) VMEM accumulator
        acc_logs = refs[n_in + 2:n_in + 2 + n_lik]

        c = pl.program_id(0)
        s = pl.program_id(1)
        b = c * inner_steps + s                   # linear (unclamped) block id

        @pl.when(s == 0)
        def _():
            acc_sq[...] = jnp.zeros_like(acc_sq)
            for a in acc_logs:
                a[...] = jnp.zeros_like(a)

        # ---- squared-error partial: unmasked fast path for full blocks ----
        @pl.when(b < full_mse)
        def _():
            d = xhat_ref[...] - tgt_ref[...]
            acc_sq[...] += d * d

        if rows_mse % br_mse:                     # ragged last block (trace-time)
            @pl.when(b == nb_mse - 1)
            def _():
                tail = rows_mse - (nb_mse - 1) * br_mse
                rows = jax.lax.broadcasted_iota(jnp.int32, (br_mse, _LANES), 0)
                d = jnp.where(rows < tail, xhat_ref[...] - tgt_ref[...], 0.0)
                acc_sq[...] += d * d

        # ---- log-likelihood partials (EUP log + VPU accumulate) ----
        for k in range(n_lik):
            @pl.when(b < full_liks[k])
            def _(lref=lik_refs[k], acc=acc_logs[k]):
                acc[...] += jnp.log(lref[...])

            if rows_liks[k] % br_liks[k]:         # ragged last block (trace-time)
                @pl.when(b == nb_liks[k] - 1)
                def _(lref=lik_refs[k], acc=acc_logs[k], br_k=br_liks[k],
                      tail=rows_liks[k] - (nb_liks[k] - 1) * br_liks[k]):
                    rows = jax.lax.broadcasted_iota(jnp.int32, (br_k, _LANES), 0)
                    vals = jnp.where(rows < tail, lref[...], 1.0)  # identity -> log=0
                    acc[...] += jnp.log(vals)

        # ---- once per chunk: cross-lane reduce + scalar SMEM store ----
        @pl.when(s == inner_steps - 1)
        def _():
            total_log = jnp.float32(0.0)
            for a in acc_logs:
                total_log = total_log + jnp.sum(a[...])
            out_ref[0, 0] = total_log
            out_ref[0, 1] = jnp.sum(acc_sq[...])

    return kernel


def _fused_rd_sums(x_hat, target, likelihoods):
    """Returns (sum(log(l)) over all likelihood tensors, sum((x_hat - target)^2))."""
    xm = _to_lane_matrix(x_hat, 0.0)
    tm = _to_lane_matrix(target, 0.0)
    lms = [_to_lane_matrix(l, 1.0) for l in likelihoods]

    rows_mse = xm.shape[0]
    rows_liks = [m.shape[0] for m in lms]

    # Per-input block rows: large for big tensors, minimally rounded for tiny ones.
    br_mse = min(_MAX_BLOCK_ROWS, _round_up(rows_mse, 8))
    br_liks = [min(_MAX_BLOCK_ROWS, _round_up(r, 8)) for r in rows_liks]

    nb_mse = _ceil_div(rows_mse, br_mse)
    nb_liks = [_ceil_div(r, b) for r, b in zip(rows_liks, br_liks)]
    total_blocks = max([nb_mse] + nb_liks) if nb_liks else nb_mse

    # Choose chunks so each chunk has >= 2 blocks of work, then drop empty chunks.
    n_chunks = max(1, min(_MAX_CHUNKS, total_blocks // 2))
    inner = _ceil_div(total_blocks, n_chunks)
    n_chunks = _ceil_div(total_blocks, inner)

    in_specs = [
        pl.BlockSpec((br_mse, _LANES), _clamped_index_map(nb_mse, inner)),
        pl.BlockSpec((br_mse, _LANES), _clamped_index_map(nb_mse, inner)),
    ] + [
        pl.BlockSpec((br, _LANES), _clamped_index_map(nb, inner))
        for br, nb in zip(br_liks, nb_liks)
    ]

    scratch_shapes = [pltpu.VMEM((br_mse, _LANES), jnp.float32)] + [
        pltpu.VMEM((br, _LANES), jnp.float32) for br in br_liks
    ]

    kernel = _make_fused_kernel(inner, br_mse, rows_mse, br_liks, rows_liks)

    partials = pl.pallas_call(
        kernel,
        out_shape=jax.ShapeDtypeStruct((n_chunks, 2), jnp.float32),
        grid_spec=pltpu.PrefetchScalarGridSpec(
            num_scalar_prefetch=0,
            grid=(n_chunks, inner),
            in_specs=in_specs,
            out_specs=pl.BlockSpec((1, 2), lambda c, s: (c, 0),
                                   memory_space=pltpu.SMEM),
            scratch_shapes=scratch_shapes,
        ),
        compiler_params=pltpu.CompilerParams(
            dimension_semantics=("parallel", "arbitrary")),
    )(xm, tm, *lms)

    return jnp.sum(partials[:, 0]), jnp.sum(partials[:, 1])


def rate_distortion_loss(out_net, target, lmbda=0.01):
    """Pallas-TPU forward of RateDistortionLoss(criterion='mse')."""
    N, _, H, W = target.shape     # NCHW, matching PyTorch
    num_pixels = N * H * W

    likelihoods = list(out_net["likelihoods"].values())
    sum_log, sum_sq = _fused_rd_sums(out_net["x_hat"], target, likelihoods)

    bpp_loss = sum_log / jnp.float32(-math.log(2) * num_pixels)
    mse_loss = sum_sq / jnp.float32(target.size)   # nn.MSELoss: mean over all elems
    weighted_mse_loss = jnp.float32(lmbda * 255.0 ** 2) * mse_loss

    return {
        "bpp_loss": bpp_loss,
        "mse_loss": mse_loss,
        "weighted_mse_loss": weighted_mse_loss,
    }
    # TODO(synk): 'ms-ssim' branch (pytorch_msssim.ms_ssim) not implemented.


if __name__ == "__main__":
    key = jax.random.PRNGKey(0)
    k1, k2, k3, k4, k5 = jax.random.split(key, 5)

    # Small shapes consistent with an image-compression net forward output.
    N, C, H, W = 2, 3, 16, 16
    target = jax.random.uniform(k1, (N, C, H, W), jnp.float32)          # NCHW, [0,1)
    x_hat = jnp.clip(
        target + 0.05 * jax.random.normal(k2, (N, C, H, W), jnp.float32), 0.0, 1.0)

    # Likelihood tensors (e.g. 'y'/'z'/'h' bottlenecks), strictly positive.
    lik_y = jax.random.uniform(k3, (N, 8, 8, 8), jnp.float32, minval=0.01, maxval=1.0)
    lik_z = jax.random.uniform(k4, (N, 8, 4, 4), jnp.float32, minval=0.01, maxval=1.0)
    # 160 elements: exercises the non-lane-aligned tail (identity pad + in-kernel mask).
    lik_h = jax.random.uniform(k5, (N, 5, 4, 4), jnp.float32, minval=0.01, maxval=1.0)

    out_net = {"x_hat": x_hat, "likelihoods": {"y": lik_y, "z": lik_z, "h": lik_h}}

    out = rate_distortion_loss(out_net, target, lmbda=0.01)
    out = jax.tree_util.tree_map(jax.block_until_ready, out)

    # Pure-JAX reference check.
    num_pixels = N * H * W
    ref_bpp = (jnp.sum(jnp.log(lik_y)) + jnp.sum(jnp.log(lik_z))
               + jnp.sum(jnp.log(lik_h))) / (-math.log(2) * num_pixels)
    ref_mse = jnp.mean((x_hat - target) ** 2)
    ref_wmse = 0.01 * 255.0 ** 2 * ref_mse

    assert jnp.allclose(out["bpp_loss"], ref_bpp, rtol=1e-4, atol=1e-5)
    assert jnp.allclose(out["mse_loss"], ref_mse, rtol=1e-4, atol=1e-7)
    assert jnp.allclose(out["weighted_mse_loss"], ref_wmse, rtol=1e-4, atol=1e-5)

    print("KERNEL_OK")
</pallas_src>

<mosaic_0001>
module attributes {stable_mosaic.version = 11 : i64} {
  func.func @kernel(%arg0: i32, %arg1: i32, %arg2: memref<16x128xf32, #tpu.memory_space<vmem>>, %arg3: memref<16x128xf32, #tpu.memory_space<vmem>>, %arg4: memref<8x128xf32, #tpu.memory_space<vmem>>, %arg5: memref<8x128xf32, #tpu.memory_space<vmem>>, %arg6: memref<8x128xf32, #tpu.memory_space<vmem>>, %arg7: memref<1x2xf32, #tpu.memory_space<smem>>, %arg8: memref<16x128xf32, #tpu.memory_space<vmem>>, %arg9: memref<8x128xf32, #tpu.memory_space<vmem>>, %arg10: memref<8x128xf32, #tpu.memory_space<vmem>>, %arg11: memref<8x128xf32, #tpu.memory_space<vmem>>) attributes {dimension_semantics = [#tpu.dimension_semantics<parallel>, #tpu.dimension_semantics<arbitrary>], iteration_bounds = array<i64: 1, 1>, scalar_prefetch = 0 : i64, scratch_operands = 4 : i64, tpu.core_type = #tpu.core_type<tc>, window_params = [{transform_indices = @transform_0, window_bounds = array<i64: 16, 128>}, {transform_indices = @transform_1, window_bounds = array<i64: 16, 128>}, {transform_indices = @transform_2, window_bounds = array<i64: 8, 128>}, {transform_indices = @transform_3, window_bounds = array<i64: 8, 128>}, {transform_indices = @transform_4, window_bounds = array<i64: 8, 128>}, {transform_indices = @transform_5, window_bounds = array<i64: 1, 2>}]} {
    %c1_i32 = arith.constant 1 : i32
    %0 = arith.muli %arg0, %c1_i32 : i32
    %1 = arith.addi %0, %arg1 : i32
    %c0_i32 = arith.constant 0 : i32
    %2 = arith.cmpi eq, %arg1, %c0_i32 : i32
    %3 = arith.extui %2 : i1 to i32
    %c0_i32_0 = arith.constant 0 : i32
    %4 = arith.cmpi ne, %3, %c0_i32_0 : i32
    scf.if %4 {
      %cst = arith.constant 0.000000e+00 : f32
      %29 = vector.broadcast %cst : f32 to vector<16x128xf32>
      %c0 = arith.constant 0 : index
      %c0_17 = arith.constant 0 : index
      %30 = vector.load %arg8[%c0, %c0_17] : memref<16x128xf32, #tpu.memory_space<vmem>>, vector<16x128xf32>
      tpu.vector_store %arg8[%c0, %c0_17], %29 {strides = array<i32>} : memref<16x128xf32, #tpu.memory_space<vmem>>, vector<16x128xf32>,
      %cst_18 = arith.constant 0.000000e+00 : f32
      %31 = vector.broadcast %cst_18 : f32 to vector<8x128xf32>
      %c0_19 = arith.constant 0 : index
      %c0_20 = arith.constant 0 : index
      %32 = vector.load %arg9[%c0_19, %c0_20] : memref<8x128xf32, #tpu.memory_space<vmem>>, vector<8x128xf32>
      tpu.vector_store %arg9[%c0_19, %c0_20], %31 {strides = array<i32>} : memref<8x128xf32, #tpu.memory_space<vmem>>, vector<8x128xf32>,
      %cst_21 = arith.constant 0.000000e+00 : f32
      %33 = vector.broadcast %cst_21 : f32 to vector<8x128xf32>
      %c0_22 = arith.constant 0 : index
      %c0_23 = arith.constant 0 : index
      %34 = vector.load %arg10[%c0_22, %c0_23] : memref<8x128xf32, #tpu.memory_space<vmem>>, vector<8x128xf32>
      tpu.vector_store %arg10[%c0_22, %c0_23], %33 {strides = array<i32>} : memref<8x128xf32, #tpu.memory_space<vmem>>, vector<8x128xf32>,
      %cst_24 = arith.constant 0.000000e+00 : f32
      %35 = vector.broadcast %cst_24 : f32 to vector<8x128xf32>
      %c0_25 = arith.constant 0 : index
      %c0_26 = arith.constant 0 : index
      %36 = vector.load %arg11[%c0_25, %c0_26] : memref<8x128xf32, #tpu.memory_space<vmem>>, vector<8x128xf32>
      tpu.vector_store %arg11[%c0_25, %c0_26], %35 {strides = array<i32>} : memref<8x128xf32, #tpu.memory_space<vmem>>, vector<8x128xf32>,
    } else {
    }
    %c0_i32_1 = arith.constant 0 : i32
    %5 = arith.cmpi slt, %1, %c0_i32_1 : i32
    %6 = arith.extui %5 : i1 to i32
    %c0_i32_2 = arith.constant 0 : i32
    %7 = arith.cmpi ne, %6, %c0_i32_2 : i32
    scf.if %7 {
      %c0 = arith.constant 0 : index
      %c0_17 = arith.constant 0 : index
      %29 = vector.load %arg2[%c0, %c0_17] : memref<16x128xf32, #tpu.memory_space<vmem>>, vector<16x128xf32>
      %c0_18 = arith.constant 0 : index
      %c0_19 = arith.constant 0 : index
      %30 = vector.load %arg3[%c0_18, %c0_19] : memref<16x128xf32, #tpu.memory_space<vmem>>, vector<16x128xf32>
      %31 = arith.subf %29, %30 : vector<16x128xf32>
      %c0_20 = arith.constant 0 : index
      %c0_21 = arith.constant 0 : index
      %32 = vector.load %arg8[%c0_20, %c0_21] : memref<16x128xf32, #tpu.memory_space<vmem>>, vector<16x128xf32>
      %33 = arith.mulf %31, %31 : vector<16x128xf32>
      %34 = arith.addf %32, %33 : vector<16x128xf32>
      %c0_22 = arith.constant 0 : index
      %c0_23 = arith.constant 0 : index
      %35 = vector.load %arg8[%c0_22, %c0_23] : memref<16x128xf32, #tpu.memory_space<vmem>>, vector<16x128xf32>
      tpu.vector_store %arg8[%c0_22, %c0_23], %34 {strides = array<i32>} : memref<16x128xf32, #tpu.memory_space<vmem>>, vector<16x128xf32>,
    } else {
    }
    %c0_i32_3 = arith.constant 0 : i32
    %8 = arith.cmpi eq, %1, %c0_i32_3 : i32
    %9 = arith.extui %8 : i1 to i32
    %c0_i32_4 = arith.constant 0 : i32
    %10 = arith.cmpi ne, %9, %c0_i32_4 : i32
    scf.if %10 {
      %29 = tpu.iota {dimensions = array<i32: 0>} : vector<16x128xi32>
      %c12_i32 = arith.constant 12 : i32
      %30 = vector.broadcast %c12_i32 : i32 to vector<16x128xi32>
      %31 = arith.cmpi slt, %29, %30 : vector<16x128xi32>
      %c0 = arith.constant 0 : index
      %c0_17 = arith.constant 0 : index
      %32 = vector.load %arg2[%c0, %c0_17] : memref<16x128xf32, #tpu.memory_space<vmem>>, vector<16x128xf32>
      %c0_18 = arith.constant 0 : index
      %c0_19 = arith.constant 0 : index
      %33 = vector.load %arg3[%c0_18, %c0_19] : memref<16x128xf32, #tpu.memory_space<vmem>>, vector<16x128xf32>
      %34 = arith.subf %32, %33 : vector<16x128xf32>
      %cst = arith.constant 0.000000e+00 : f32
      %35 = vector.broadcast %cst : f32 to vector<16x128xf32>
      %36 = arith.select %31, %34, %35 : vector<16x128xi1>, vector<16x128xf32>
      %c0_20 = arith.constant 0 : index
      %c0_21 = arith.constant 0 : index
      %37 = vector.load %arg8[%c0_20, %c0_21] : memref<16x128xf32, #tpu.memory_space<vmem>>, vector<16x128xf32>
      %38 = arith.mulf %36, %36 : vector<16x128xf32>
      %39 = arith.addf %37, %38 : vector<16x128xf32>
      %c0_22 = arith.constant 0 : index
      %c0_23 = arith.constant 0 : index
      %40 = vector.load %arg8[%c0_22, %c0_23] : memref<16x128xf32, #tpu.memory_space<vmem>>, vector<16x128xf32>
      tpu.vector_store %arg8[%c0_22, %c0_23], %39 {strides = array<i32>} : memref<16x128xf32, #tpu.memory_space<vmem>>, vector<16x128xf32>,
    } else {
    }
    %c1_i32_5 = arith.constant 1 : i32
    %11 = arith.cmpi slt, %1, %c1_i32_5 : i32
    %12 = arith.extui %11 : i1 to i32
    %c0_i32_6 = arith.constant 0 : i32
    %13 = arith.cmpi ne, %12, %c0_i32_6 : i32
    scf.if %13 {
      %c0 = arith.constant 0 : index
      %c0_17 = arith.constant 0 : index
      %29 = vector.load %arg9[%c0, %c0_17] : memref<8x128xf32, #tpu.memory_space<vmem>>, vector<8x128xf32>
      %c0_18 = arith.constant 0 : index
      %c0_19 = arith.constant 0 : index
      %30 = vector.load %arg4[%c0_18, %c0_19] : memref<8x128xf32, #tpu.memory_space<vmem>>, vector<8x128xf32>
      %31 = math.log %30 : vector<8x128xf32>
      %32 = arith.addf %29, %31 : vector<8x128xf32>
      %c0_20 = arith.constant 0 : index
      %c0_21 = arith.constant 0 : index
      %33 = vector.load %arg9[%c0_20, %c0_21] : memref<8x128xf32, #tpu.memory_space<vmem>>, vector<8x128xf32>
      tpu.vector_store %arg9[%c0_20, %c0_21], %32 {strides = array<i32>} : memref<8x128xf32, #tpu.memory_space<vmem>>, vector<8x128xf32>,
    } else {
    }
    %c0_i32_7 = arith.constant 0 : i32
    %14 = arith.cmpi slt, %1, %c0_i32_7 : i32
    %15 = arith.extui %14 : i1 to i32
    %c0_i32_8 = arith.constant 0 : i32
    %16 = arith.cmpi ne, %15, %c0_i32_8 : i32
    scf.if %16 {
      %c0 = arith.constant 0 : index
      %c0_17 = arith.constant 0 : index
      %29 = vector.load %arg10[%c0, %c0_17] : memref<8x128xf32, #tpu.memory_space<vmem>>, vector<8x128xf32>
      %c0_18 = arith.constant 0 : index
      %c0_19 = arith.constant 0 : index
      %30 = vector.load %arg5[%c0_18, %c0_19] : memref<8x128xf32, #tpu.memory_space<vmem>>, vector<8x128xf32>
      %31 = math.log %30 : vector<8x128xf32>
      %32 = arith.addf %29, %31 : vector<8x128xf32>
      %c0_20 = arith.constant 0 : index
      %c0_21 = arith.constant 0 : index
      %33 = vector.load %arg10[%c0_20, %c0_21] : memref<8x128xf32, #tpu.memory_space<vmem>>, vector<8x128xf32>
      tpu.vector_store %arg10[%c0_20, %c0_21], %32 {strides = array<i32>} : memref<8x128xf32, #tpu.memory_space<vmem>>, vector<8x128xf32>,
    } else {
    }
    %c0_i32_9 = arith.constant 0 : i32
    %17 = arith.cmpi eq, %1, %c0_i32_9 : i32
    %18 = arith.extui %17 : i1 to i32
    %c0_i32_10 = arith.constant 0 : i32
    %19 = arith.cmpi ne, %18, %c0_i32_10 : i32
    scf.if %19 {
      %29 = tpu.iota {dimensions = array<i32: 0>} : vector<8x128xi32>
      %c2_i32 = arith.constant 2 : i32
      %30 = vector.broadcast %c2_i32 : i32 to vector<8x128xi32>
      %31 = arith.cmpi slt, %29, %30 : vector<8x128xi32>
      %c0 = arith.constant 0 : index
      %c0_17 = arith.constant 0 : index
      %32 = vector.load %arg5[%c0, %c0_17] : memref<8x128xf32, #tpu.memory_space<vmem>>, vector<8x128xf32>
      %cst = arith.constant 1.000000e+00 : f32
      %33 = vector.broadcast %cst : f32 to vector<8x128xf32>
      %34 = arith.select %31, %32, %33 : vector<8x128xi1>, vector<8x128xf32>
      %c0_18 = arith.constant 0 : index
      %c0_19 = arith.constant 0 : index
      %35 = vector.load %arg10[%c0_18, %c0_19] : memref<8x128xf32, #tpu.memory_space<vmem>>, vector<8x128xf32>
      %36 = math.log %34 : vector<8x128xf32>
      %37 = arith.addf %35, %36 : vector<8x128xf32>
      %c0_20 = arith.constant 0 : index
      %c0_21 = arith.constant 0 : index
      %38 = vector.load %arg10[%c0_20, %c0_21] : memref<8x128xf32, #tpu.memory_space<vmem>>, vector<8x128xf32>
      tpu.vector_store %arg10[%c0_20, %c0_21], %37 {strides = array<i32>} : memref<8x128xf32, #tpu.memory_space<vmem>>, vector<8x128xf32>,
    } else {
    }
    %c0_i32_11 = arith.constant 0 : i32
    %20 = arith.cmpi slt, %1, %c0_i32_11 : i32
    %21 = arith.extui %20 : i1 to i32
    %c0_i32_12 = arith.constant 0 : i32
    %22 = arith.cmpi ne, %21, %c0_i32_12 : i32
    scf.if %22 {
      %c0 = arith.constant 0 : index
      %c0_17 = arith.constant 0 : index
      %29 = vector.load %arg11[%c0, %c0_17] : memref<8x128xf32, #tpu.memory_space<vmem>>, vector<8x128xf32>
      %c0_18 = arith.constant 0 : index
      %c0_19 = arith.constant 0 : index
      %30 = vector.load %arg6[%c0_18, %c0_19] : memref<8x128xf32, #tpu.memory_space<vmem>>, vector<8x128xf32>
      %31 = math.log %30 : vector<8x128xf32>
      %32 = arith.addf %29, %31 : vector<8x128xf32>
      %c0_20 = arith.constant 0 : index
      %c0_21 = arith.constant 0 : index
      %33 = vector.load %arg11[%c0_20, %c0_21] : memref<8x128xf32, #tpu.memory_space<vmem>>, vector<8x128xf32>
      tpu.vector_store %arg11[%c0_20, %c0_21], %32 {strides = array<i32>} : memref<8x128xf32, #tpu.memory_space<vmem>>, vector<8x128xf32>,
    } else {
    }
    %c0_i32_13 = arith.constant 0 : i32
    %23 = arith.cmpi eq, %1, %c0_i32_13 : i32
    %24 = arith.extui %23 : i1 to i32
    %c0_i32_14 = arith.constant 0 : i32
    %25 = arith.cmpi ne, %24, %c0_i32_14 : i32
    scf.if %25 {
      %29 = tpu.iota {dimensions = array<i32: 0>} : vector<8x128xi32>
      %c2_i32 = arith.constant 2 : i32
      %30 = vector.broadcast %c2_i32 : i32 to vector<8x128xi32>
      %31 = arith.cmpi slt, %29, %30 : vector<8x128xi32>
      %c0 = arith.constant 0 : index
      %c0_17 = arith.constant 0 : index
      %32 = vector.load %arg6[%c0, %c0_17] : memref<8x128xf32, #tpu.memory_space<vmem>>, vector<8x128xf32>
      %cst = arith.constant 1.000000e+00 : f32
      %33 = vector.broadcast %cst : f32 to vector<8x128xf32>
      %34 = arith.select %31, %32, %33 : vector<8x128xi1>, vector<8x128xf32>
      %c0_18 = arith.constant 0 : index
      %c0_19 = arith.constant 0 : index
      %35 = vector.load %arg11[%c0_18, %c0_19] : memref<8x128xf32, #tpu.memory_space<vmem>>, vector<8x128xf32>
      %36 = math.log %34 : vector<8x128xf32>
      %37 = arith.addf %35, %36 : vector<8x128xf32>
      %c0_20 = arith.constant 0 : index
      %c0_21 = arith.constant 0 : index
      %38 = vector.load %arg11[%c0_20, %c0_21] : memref<8x128xf32, #tpu.memory_space<vmem>>, vector<8x128xf32>
      tpu.vector_store %arg11[%c0_20, %c0_21], %37 {strides = array<i32>} : memref<8x128xf32, #tpu.memory_space<vmem>>, vector<8x128xf32>,
    } else {
    }
    %c0_i32_15 = arith.constant 0 : i32
    %26 = arith.cmpi eq, %arg1, %c0_i32_15 : i32
    %27 = arith.extui %26 : i1 to i32
    %c0_i32_16 = arith.constant 0 : i32
    %28 = arith.cmpi ne, %27, %c0_i32_16 : i32
    scf.if %28 {
      %c0 = arith.constant 0 : index
      %c0_17 = arith.constant 0 : index
      %29 = vector.load %arg9[%c0, %c0_17] : memref<8x128xf32, #tpu.memory_space<vmem>>, vector<8x128xf32>
      %30 = vector.shape_cast %29 : vector<8x128xf32> to vector<1x8x128xf32>
      %cst = arith.constant dense<0.000000e+00> : vector<1xf32>
      %31 = vector.multi_reduction <add>, %30, %cst [1, 2] : vector<1x8x128xf32> to vector<1xf32>
      %32 = vector.shape_cast %31 : vector<1xf32> to vector<1x1x1xf32>
      %33 = vector.extract %32[0, 0, 0] : f32 from vector<1x1x1xf32>
      %cst_18 = arith.constant 0.000000e+00 : f32
      %34 = arith.addf %cst_18, %33 : f32
      %c0_19 = arith.constant 0 : index
      %c0_20 = arith.constant 0 : index
      %35 = vector.load %arg10[%c0_19, %c0_20] : memref<8x128xf32, #tpu.memory_space<vmem>>, vector<8x128xf32>
      %36 = vector.shape_cast %35 : vector<8x128xf32> to vector<1x8x128xf32>
      %cst_21 = arith.constant dense<0.000000e+00> : vector<1xf32>
      %37 = vector.multi_reduction <add>, %36, %cst_21 [1, 2] : vector<1x8x128xf32> to vector<1xf32>
      %38 = vector.shape_cast %37 : vector<1xf32> to vector<1x1x1xf32>
      %39 = vector.extract %38[0, 0, 0] : f32 from vector<1x1x1xf32>
      %40 = arith.addf %34, %39 : f32
      %c0_22 = arith.constant 0 : index
      %c0_23 = arith.constant 0 : index
      %41 = vector.load %arg11[%c0_22, %c0_23] : memref<8x128xf32, #tpu.memory_space<vmem>>, vector<8x128xf32>
      %42 = vector.shape_cast %41 : vector<8x128xf32> to vector<1x8x128xf32>
      %cst_24 = arith.constant dense<0.000000e+00> : vector<1xf32>
      %43 = vector.multi_reduction <add>, %42, %cst_24 [1, 2] : vector<1x8x128xf32> to vector<1xf32>
      %44 = vector.shape_cast %43 : vector<1xf32> to vector<1x1x1xf32>
      %45 = vector.extract %44[0, 0, 0] : f32 from vector<1x1x1xf32>
      %46 = arith.addf %40, %45 : f32
      %c0_25 = arith.constant 0 : index
      %c0_26 = arith.constant 0 : index
      %47 = memref.load %arg7[%c0_25, %c0_26] : memref<1x2xf32, #tpu.memory_space<smem>>
      memref.store %46, %arg7[%c0_25, %c0_26] : memref<1x2xf32, #tpu.memory_space<smem>>
      %c0_27 = arith.constant 0 : index
      %c0_28 = arith.constant 0 : index
      %48 = vector.load %arg8[%c0_27, %c0_28] : memref<16x128xf32, #tpu.memory_space<vmem>>, vector<16x128xf32>
      %49 = vector.shape_cast %48 : vector<16x128xf32> to vector<1x16x128xf32>
      %cst_29 = arith.constant dense<0.000000e+00> : vector<1xf32>
      %50 = vector.multi_reduction <add>, %49, %cst_29 [1, 2] : vector<1x16x128xf32> to vector<1xf32>
      %51 = vector.shape_cast %50 : vector<1xf32> to vector<1x1x1xf32>
      %52 = vector.extract %51[0, 0, 0] : f32 from vector<1x1x1xf32>
      %c0_30 = arith.constant 0 : index
      %c1 = arith.constant 1 : index
      %53 = memref.load %arg7[%c0_30, %c1] : memref<1x2xf32, #tpu.memory_space<smem>>
      memref.store %52, %arg7[%c0_30, %c1] : memref<1x2xf32, #tpu.memory_space<smem>>
    } else {
    }
    return
  }
  func.func @transform_0(%arg0: i32, %arg1: i32) -> (i32, i32) {
    %c1_i32 = arith.constant 1 : i32
    %0 = arith.muli %arg0, %c1_i32 : i32
    %1 = arith.addi %0, %arg1 : i32
    %c0_i32 = arith.constant 0 : i32
    %2 = arith.minsi %1, %c0_i32 : i32
    %c0_i32_0 = arith.constant 0 : i32
    %c0_i32_1 = arith.constant 0 : i32
    return %2, %c0_i32_0 : i32, i32
  }
  func.func @transform_1(%arg0: i32, %arg1: i32) -> (i32, i32) {
    %c1_i32 = arith.constant 1 : i32
    %0 = arith.muli %arg0, %c1_i32 : i32
    %1 = arith.addi %0, %arg1 : i32
    %c0_i32 = arith.constant 0 : i32
    %2 = arith.minsi %1, %c0_i32 : i32
    %c0_i32_0 = arith.constant 0 : i32
    %c0_i32_1 = arith.constant 0 : i32
    return %2, %c0_i32_0 : i32, i32
  }
  func.func @transform_2(%arg0: i32, %arg1: i32) -> (i32, i32) {
    %c1_i32 = arith.constant 1 : i32
    %0 = arith.muli %arg0, %c1_i32 : i32
    %1 = arith.addi %0, %arg1 : i32
    %c0_i32 = arith.constant 0 : i32
    %2 = arith.minsi %1, %c0_i32 : i32
    %c0_i32_0 = arith.constant 0 : i32
    %c0_i32_1 = arith.constant 0 : i32
    return %2, %c0_i32_0 : i32, i32
  }
  func.func @transform_3(%arg0: i32, %arg1: i32) -> (i32, i32) {
    %c1_i32 = arith.constant 1 : i32
    %0 = arith.muli %arg0, %c1_i32 : i32
    %1 = arith.addi %0, %arg1 : i32
    %c0_i32 = arith.constant 0 : i32
    %2 = arith.minsi %1, %c0_i32 : i32
    %c0_i32_0 = arith.constant 0 : i32
    %c0_i32_1 = arith.constant 0 : i32
    return %2, %c0_i32_0 : i32, i32
  }
  func.func @transform_4(%arg0: i32, %arg1: i32) -> (i32, i32) {
    %c1_i32 = arith.constant 1 : i32
    %0 = arith.muli %arg0, %c1_i32 : i32
    %1 = arith.addi %0, %arg1 : i32
    %c0_i32 = arith.constant 0 : i32
    %2 = arith.minsi %1, %c0_i32 : i32
    %c0_i32_0 = arith.constant 0 : i32
    %c0_i32_1 = arith.constant 0 : i32
    return %2, %c0_i32_0 : i32, i32
  }
  func.func @transform_5(%arg0: i32, %arg1: i32) -> (i32, i32) {
    %c0_i32 = arith.constant 0 : i32
    %c0_i32_0 = arith.constant 0 : i32
    return %arg0, %c0_i32 : i32, i32
  }
}

</mosaic_0001>

<bundles_post_ra>
// kernel: tpu_custom_call.1
= control target key start
LH: loop header
LB: loop body
LE: loop exit
PB: predicated region body
PF: predicated region fallthrough
CT: control target
= control target key end

     0   :  { %10 = vsyncpa [#allocation7], 0  ;;  %s556_s0 = inlined_call_operand.hbm [shape: f32[12,128], index: 0, kind: input, shape index: {}]   ;;  %s557_s1 = inlined_call_operand.hbm [shape: f32[12,128], index: 1, kind: input, shape index: {}]   ;;  %s558_s2 = inlined_call_operand.hbm [shape: f32[8,128], index: 2, kind: input, shape index: {}]   ;;  %s559_s3 = inlined_call_operand.vmem [shape: f32[2,128], index: 3, kind: input, shape index: {}]   ;;  %s560_s4 = inlined_call_operand.hbm [shape: f32[2,128], index: 4, kind: input, shape index: {}]   ;;  %s561_s5 = inlined_call_operand.hbm [shape: f32[1,2], index: 5, kind: output, shape index: {}]  }
   0x1   :  { %11 = vsyncpa [#allocation10], 0 }
   0x2   :  { %12 = vsyncpa [#allocation13], 0 }
   0x3   :  { %13 = vsyncpa [#allocation8], 0  ;;  %s43_s20 = sshll.u32 %s557_s1, 4  ;;  %s499_s21 = smov [#allocation9]   ;;  %s44_s20 = int_to_ptr.hbm [resolvable:$true] %s43_s20 }
   0x4   :  { %s45_s22 = sshll.u32 %s499_s21, 4  ;;  %s24_s25 = sshll.u32 %s556_s0, 4  ;;  %s46_s22 = int_to_ptr.vmem [resolvable:$true] %s45_s22  ;;  %s25_s25 = int_to_ptr.hbm [resolvable:$true] %s24_s25 }
   0x5   :  { %s500_s26 = smov 128   ;;  %s501_s27 = smov 8  }
   0x6   :  { %51 = dma.hbm_to_vmem [thread:$0]  %s44_s20, 256, %s46_s22, [#allocation10], %s500_s26, %s500_s26, %s501_s27  }
   0x7   :  { %s502_s28 = smov [#allocation6]   ;;  %s62_s7 = sshll.u32 %s558_s2, 4  ;;  %s63_s7 = int_to_ptr.hbm [resolvable:$true] %s62_s7 }
   0x8   :  { %s26_s29 = sshll.u32 %s502_s28, 4  ;;  %s503_s1 = smov [#allocation11]   ;;  %s27_s29 = int_to_ptr.vmem [resolvable:$true] %s26_s29 }
   0x9   :  { %32 = dma.hbm_to_vmem [thread:$0]  %s25_s25, 256, %s27_s29, [#allocation7], %s500_s26, %s500_s26, %s501_s27  }
   0xa   :  { %s64_s8 = sshll.u32 %s503_s1, 4  ;;  %s65_s8 = int_to_ptr.vmem [resolvable:$true] %s64_s8 }
   0xb   :  { %67 = dma.hbm_to_vmem [thread:$0]  %s63_s7, 128, %s65_s8, [#allocation10]  }
   0xc   :  { %96 = vsyncadd [#allocation13], 96  ;;  %s101_s10 = sshll.u32 %s560_s4, 4  ;;  %s504_s11 = smov [#allocation12]   ;;  %s102_s10 = int_to_ptr.hbm [resolvable:$true] %s101_s10 }
   0xd   :  { %s103_s12 = sshll.u32 %s504_s11, 4  ;;  %s505_s13 = smov 32   ;;  %s104_s12 = int_to_ptr.vmem [resolvable:$true] %s103_s12 }
   0xe   :  { %s506_s14 = smov 2  }
   0xf   :  { %109 = dma.hbm_to_vmem [thread:$0]  %s102_s10, 32, %s104_s12, [#allocation13], %s505_s13, %s505_s13, %s506_s14  }
  0x10   :  { %491 = dma.done.wait [#allocation7], 256  }
  0x11   :  { %492 = vsyncadd [#allocation7], 4294967040 }
  0x12   :  { %493 = dma.done.wait [#allocation10], 384  }
  0x13   :  { %494 = vsyncadd [#allocation10], 4294966912 }
  0x14   :  { %495 = dma.done.wait [#allocation13], 128  }
  0x15   :  { %496 = vsyncadd [#allocation13], 4294967168  ;;  %v201_v0 = vlaneseq  ;;  %v227_v2 = vld [vmem:[#allocation11] sm:$0xff]  ;;  %v269_v3 = vld [vmem:[#allocation12] sm:$0xff]  ;;  %s333_s18 = sshll.u32 %s561_s5, 4  ;;  %s507_s23 = smov [#allocation14]   ;;  %s334_s18 = int_to_ptr.hbm [resolvable:$true] %s333_s18 }
  0x16   :  { %v247_v4 = vld [vmem:[%s559_s3] sm:$0xff]  ;;  %377 = vlog2.f32 %v227_v2  ;;  %v207_v7 = vld [vmem:[#allocation6 + $0x8] sm:$0xff]  ;;  %v209_v9 = vld [vmem:[#allocation9 + $0x8] sm:$0xff] }
  0x17   :  { %v202_v1 = vshrl.u32 %v201_v0, 7  ;;  %v206_v10 = vld [vmem:[#allocation6] sm:$0xff]  ;;  %v208_v11 = vld [vmem:[#allocation9] sm:$0xff]  ;;  %v211_v12 = vsub.f32 %v207_v7, %v209_v9 }
  0x18   :  { %v210_v14 = vsub.f32 %v206_v10, %v208_v11 }
  0x19   :  { %vm246_vm0 = vcmp.lt.s32.totalorder %v202_v1, 2  ;;  %v203_v6 = vadd.s32 8, %v202_v1 }
  0x1a   :  { %v270_v5 = vsel %vm246_vm0, %v269_v3, 1.0  ;;  %v248_v8 = vsel %vm246_vm0, %v247_v4, 1.0  ;;  %v216_v20 = vmul.f32 %v210_v14, %v210_v14 }
  0x1b   :  { %379 = vlog2.f32 %v270_v5  ;;  %vm205_vm1 = vcmp.lt.s32.totalorder %v203_v6, 12 }
  0x1c   :  { %381 = vlog2.f32 %v248_v8  ;;  %v378_v13 = vpop.eup %377  ;;  %v213_v17 = vsel %vm205_vm1, %v211_v12, 0.0 }
  0x1d   :  { %v229_v16 = vmul.f32 0.6931472, %v378_v13  ;;  %v217_v21 = vmul.f32 %v213_v17, %v213_v17 }
  0x1f   :  { %280 = vadd.xlane.f32.xlu0 %v229_v16  ;;  %v316_v23 = vadd.f32 %v217_v21, %v216_v20 }
  0x21   :  { %v380_v15 = vpop.eup %379 }
  0x22   :  { %v273_v18 = vmul.f32 0.6931472, %v380_v15  ;;  %v382_v19 = vpop.eup %381 }
  0x23   :  { %v251_v22 = vmul.f32 0.6931472, %v382_v19 }
  0x24   :  { %302 = vadd.xlane.f32.xlu1 %v273_v18 }
  0x27   :  { %291 = vadd.xlane.f32.xlu0 %v251_v22 }
  0x2c   :  { %317 = vadd.xlane.f32.xlu1 %v316_v23 }
  0x92   :  { %v281_v24 = vpop.xlane.xlu0 %280 }
  0x93   :  { %v282_v25 = vrot.slane %v281_v24, 4 }
  0x95   :  { %v283_v28 = vadd.f32 %v282_v25, %v281_v24 }
  0x97   :  { %v303_v26 = vpop.xlane.xlu1 %302  ;;  %v284_v30 = vrot.slane %v283_v28, 2 }
  0x98   :  { %v304_v27 = vrot.slane %v303_v26, 4 }
  0x99   :  { %v285_v31 = vadd.f32 %v284_v30, %v283_v28 }
  0x9a   :  { %v305_v29 = vadd.f32 %v304_v27, %v303_v26  ;;  %v292_v33 = vpop.xlane.xlu0 %291 }
  0x9b   :  { %v293_v34 = vrot.slane %v292_v33, 4  ;;  %v286_v36 = vrot.slane %v285_v31, 1 }
  0x9c   :  { %v306_v32 = vrot.slane %v305_v29, 2 }
  0x9d   :  { %v294_v38 = vadd.f32 %v293_v34, %v292_v33  ;;  %v287_v39 = vadd.f32 %v286_v36, %v285_v31 }
  0x9e   :  { %v307_v41 = vadd.f32 %v306_v32, %v305_v29 }
  0x9f   :  { %v318_v35 = vpop.xlane.xlu1 %317  ;;  %v295_v42 = vrot.slane %v294_v38, 2  ;;  %360 = vpush %v287_v39 }
  0xa0   :  { %v319_v37 = vrot.slane %v318_v35, 4  ;;  %v308_v46 = vrot.slane %v307_v41, 1 }
  0xa1   :  { %v296_v44 = vadd.f32 %v295_v42, %v294_v38 }
  0xa2   :  { %v320_v40 = vadd.f32 %v319_v37, %v318_v35  ;;  %v309_v50 = vadd.f32 %v308_v46, %v307_v41 }
  0xa3   :  { %v297_v47 = vrot.slane %v296_v44, 1 }
  0xa4   :  { %v321_v43 = vrot.slane %v320_v40, 2 }
  0xa5   :  { %v298_v49 = vadd.f32 %v297_v47, %v296_v44 }
  0xa6   :  { %v322_v45 = vadd.f32 %v321_v43, %v320_v40 }
  0xa7   :  { %362 = vpush %v298_v49 }
  0xa8   :  { %v323_v48 = vrot.slane %v322_v45, 1  ;;  %364 = vpush %v309_v50 }
  0xaa   :  { %v324_v51 = vadd.f32 %v323_v48, %v322_v45 }
  0xac   :  { %366 = vpush %v324_v51 }
  0xd0   :  { %s361_s3 = spop %360 }
  0xd8   :  { %s363_s15 = spop %362 }
  0xd9   :  { %s300_s19 = sadd.f32 %s363_s15, %s361_s3  ;;  %s365_s20 = spop %364 }
  0xdb   :  { %s311_s22 = sadd.f32 %s365_s20, %s300_s19 }
  0xdd   :  { %s367_s21 = spop %366  ;;  %313 = sst [smem:[#allocation14]] %s311_s22 }
  0xde   :  { %327 = sst [smem:[#allocation14 + $0x1]] %s367_s21 }
  0xdf   :  { %336 = dma.smem_to_hbm %s507_s23, 16, %s334_s18, [#allocation8]  }
  0xe0   :  { %497 = dma.done.wait [#allocation8], 16  }
  0xe1   :  { %498 = vsyncadd [#allocation8], 4294967280 }
  0xe2   :  { %341 = sfence }
  0xe3   :  { %342 = vsyncpa [#allocation7], 1 }
  0xe4   :  { %343 = vsyncpa [#allocation10], 1 }
  0xe5   :  { %344 = vsyncpa [#allocation13], 1 }
  0xe6   :  { %345 = vsyncpa [#allocation8], 1 }

</bundles_post_ra>
